<compile_context>
chip_gen: v7x
topology: tpu7x:2x2x1
jax: 0.10.0
libtpu: 0.0.40
codegen_flags: <defaults>
</compile_context>

<pallas_src>
import functools

import jax
import jax.numpy as jnp
from jax.experimental import pallas as pl
from jax.experimental.pallas import tpu as pltpu

_MiB = 1024 * 1024


# --------------------------------------------------------------------------- #
# Kernel
# --------------------------------------------------------------------------- #
def _ffn_kernel(x_ref, w13_ref, w2_ref, o_ref, acc_ref, *, tile_h):
    """Grid = (M tiles, H tiles).  H (axis 1) is the reduction axis.

    Per step (m, h):
      gv    = x_tile @ [w1_tile | w3_tile]        # [tm, 2*th], f32 acc
      g     = silu(gv[:, :th]) * gv[:, th:]       # [tm, th],   f32
      acc  += g @ w2_tile                         # [tm, D],    f32
    """
    h = pl.program_id(1)

    @pl.when(h == 0)
    def _():
        acc_ref[...] = jnp.zeros_like(acc_ref)

    # Fused gate/value matmul (bf16 inputs, f32 accumulation on the MXU).
    gv = jnp.dot(x_ref[...], w13_ref[...], preferred_element_type=jnp.float32)
    gate = gv[:, :tile_h]
    val = gv[:, tile_h:]
    # SiLU(z) = z / (1 + exp(-z)); exp and approx reciprocal both go to the EUP
    # slot, keeping the VPU free (only matters once weight DMA is hidden).
    gated = gate * pl.reciprocal(1.0 + jnp.exp(-gate), approx=True) * val

    acc_ref[...] += jnp.dot(
        gated.astype(w2_ref.dtype), w2_ref[...],
        preferred_element_type=jnp.float32,
    )

    @pl.when(h == pl.num_programs(1) - 1)
    def _():
        o_ref[...] = acc_ref[...].astype(o_ref.dtype)


# --------------------------------------------------------------------------- #
# Planning / packing helpers (run once at model init, not in the hot path)
# --------------------------------------------------------------------------- #
def _round_up(v, m):
    return m * ((v + m - 1) // m)


def _pick_divisor_tile(total, preferred, granularity):
    """Largest multiple of `granularity` that divides `total` and is <= preferred."""
    t = max(granularity, min(preferred, total))
    t = max((t // granularity) * granularity, granularity)
    while total % t != 0:
        t -= granularity
    return t


def _tpu_generation_and_vmem():
    """Best-effort (generation, physical VMEM bytes) detection."""
    vmem = None
    try:
        info = pltpu.get_tpu_info()
        vmem = int(getattr(info, "vmem_capacity_bytes", 0)) or None
    except Exception:
        vmem = None
    kind = ""
    try:
        kind = jax.devices()[0].device_kind.lower()
    except Exception:
        pass
    gen = None
    for g in (7, 6, 5, 4):
        if (f"v{g}" in kind) or kind.startswith(f"tpu{g}") or (f"tpu {g}" in kind):
            gen = g
            break
    if gen is None and vmem is not None and vmem <= 64 * _MiB:
        gen = 7  # 64 MiB/TC strongly suggests v7x
    if vmem is None:
        vmem = 64 * _MiB if gen == 7 else 128 * _MiB
    return gen, vmem


def make_ffn_plan(dim, hidden, *, compute_dtype=jnp.bfloat16):
    """Pick per-generation tile sizes and VMEM budget (once, at model init)."""
    assert dim % 128 == 0, "model dim must be a multiple of 128"
    assert hidden % 128 == 0, "hidden dim must be a multiple of 128"
    gen, vmem_cap = _tpu_generation_and_vmem()

    if gen == 7:
        # 64 MiB/TC VMEM; per-TC roofline knee ~620 FLOP/B with megacore
        # weight re-streaming -> tm ~640-768, th=256 to fit under ~56 MiB.
        tm_pref, th_pref, budget = 768, 256, 56 * _MiB
    elif gen == 6:
        # 128 MiB VMEM; knee ~720 FLOP/B -> tm=1024 with th=512 fits ~83 MiB.
        tm_pref, th_pref, budget = 1024, 512, 100 * _MiB
    elif gen is not None and gen <= 5:
        # v5e knee is only ~240 FLOP/B -> tm=384 already compute-bound.
        tm_pref, th_pref, budget = 384, 512, 100 * _MiB
    else:
        # Unknown chip: conservative tiles, safe under 64 MiB physical VMEM.
        tm_pref, th_pref, budget = 512, 256, 56 * _MiB

    budget = min(budget, max(vmem_cap - 8 * _MiB, 32 * _MiB))
    tile_h = _pick_divisor_tile(hidden, th_pref, 128)
    return dict(
        tile_h=int(tile_h),
        tile_m_pref=int(tm_pref),
        vmem_limit_bytes=int(budget),
        compute_dtype=compute_dtype,
    )


def pack_ffn_weights(w1, w3, w2, *, tile_h, compute_dtype=jnp.bfloat16):
    """Fuse/re-layout weights ONCE at model init (hoisted out of the hot path).

    w1, w3: [D, H] (transposed nn.Linear), w2: [H, D]
    Returns:
      w13: [Hn, D, 2*tile_h]  per-tile contiguous [w1_tile | w3_tile] slabs
      w2t: [Hn, tile_h, D]    per-tile contiguous w2 slabs
    """
    D, H = w1.shape
    assert H % tile_h == 0
    Hn = H // tile_h
    w13 = jnp.concatenate(
        [w1.reshape(D, Hn, tile_h), w3.reshape(D, Hn, tile_h)], axis=-1
    )
    w13 = jnp.transpose(w13, (1, 0, 2)).astype(compute_dtype)   # [Hn, D, 2*th]
    w2t = w2.reshape(Hn, tile_h, D).astype(compute_dtype)       # [Hn, th, D]
    return w13, w2t


def _vmem_footprint_bytes(tm, th, d, out_itemsize, c_itemsize):
    """Estimated VMEM use: double-buffered tiles + f32 acc + compiler temps."""
    x_tiles = 2 * tm * d * c_itemsize            # x, double-buffered
    out_tiles = 2 * tm * d * out_itemsize        # output, double-buffered
    acc = tm * d * 4                             # f32 accumulator (single)
    w13_tiles = 2 * d * (2 * th) * c_itemsize    # fused w1|w3, double-buffered
    w2_tiles = 2 * th * d * c_itemsize           # w2, double-buffered
    temps = tm * th * (12 + c_itemsize)          # gv(f32) + gated(f32) + cast
    return x_tiles + out_tiles + acc + w13_tiles + w2_tiles + temps


# --------------------------------------------------------------------------- #
# Hot-path entry point (expects pre-packed weights)
# --------------------------------------------------------------------------- #
@functools.partial(
    jax.jit, static_argnames=("tile_h", "tile_m_pref", "vmem_limit_bytes")
)
def feed_forward(x, w13, w2_t, *, tile_h, tile_m_pref, vmem_limit_bytes):
    """x: [M, D]; w13: [Hn, D, 2*tile_h]; w2_t: [Hn, tile_h, D]  ->  [M, D]."""
    M, D = x.shape
    Hn = w13.shape[0]
    H = Hn * tile_h
    assert w13.shape == (Hn, D, 2 * tile_h)
    assert w2_t.shape == (Hn, tile_h, D)
    assert D % 128 == 0 and tile_h % 128 == 0

    compute_dtype = w13.dtype
    out_dtype = x.dtype
    c_it = jnp.dtype(compute_dtype).itemsize
    o_it = jnp.dtype(out_dtype).itemsize

    # --- M tile: prefer the largest tm (weight-streaming intensity ~ tm
    # FLOP/byte); shrink only if the VMEM budget would be exceeded.  M is then
    # padded UP to a multiple of tm (never shrink tm to divide M).
    tm = _round_up(min(tile_m_pref, _round_up(M, 16)), 16)
    while tm > 16 and _vmem_footprint_bytes(tm, tile_h, D, o_it, c_it) > int(
        0.92 * vmem_limit_bytes
    ):
        tm = max(tm - (64 if tm > 64 else 16), 16)

    M_pad = _round_up(M, tm)
    n_m = M_pad // tm

    x_c = x.astype(compute_dtype)
    if M_pad != M:
        x_c = jnp.pad(x_c, ((0, M_pad - M), (0, 0)))   # zero rows -> zero out

    # --- cost estimate: weights are re-streamed once per M tile --------------
    flops = 6 * M_pad * D * H                      # 2*(M*D*2H) + 2*(M*H*D)
    bytes_accessed = int(
        n_m * (w13.size + w2_t.size) * c_it        # weights, per M tile
        + M_pad * D * c_it                         # activations in
        + M_pad * D * o_it                         # output
    )
    cost = pl.CostEstimate(
        flops=flops, transcendentals=2 * M_pad * H, bytes_accessed=bytes_accessed
    )

    out = pl.pallas_call(
        functools.partial(_ffn_kernel, tile_h=tile_h),
        out_shape=jax.ShapeDtypeStruct((M_pad, D), out_dtype),
        grid_spec=pltpu.PrefetchScalarGridSpec(
            num_scalar_prefetch=0,
            grid=(n_m, Hn),                        # M (parallel), H (reduction, last)
            in_specs=[
                pl.BlockSpec((tm, D), lambda m, h: (m, 0)),               # x tile
                pl.BlockSpec((None, D, 2 * tile_h), lambda m, h: (h, 0, 0)),  # w1|w3
                pl.BlockSpec((None, tile_h, D), lambda m, h: (h, 0, 0)),      # w2
            ],
            out_specs=pl.BlockSpec((tm, D), lambda m, h: (m, 0)),
            scratch_shapes=[pltpu.VMEM((tm, D), jnp.float32)],             # f32 acc
        ),
        compiler_params=pltpu.CompilerParams(
            dimension_semantics=("parallel", "arbitrary"),
            vmem_limit_bytes=int(vmem_limit_bytes),
        ),
        cost_estimate=cost,
    )(x_c, w13, w2_t)

    if M_pad != M:
        out = out[:M]
    return out


def _round_hidden(dim, multiple_of, ffn_dim_multiplier=None):
    hidden = int((ffn_dim_multiplier or 8 / 3) * dim)
    return multiple_of * ((hidden + multiple_of - 1) // multiple_of)


# --------------------------------------------------------------------------- #
# Demo / correctness check
# --------------------------------------------------------------------------- #
if __name__ == "__main__":
    # Small, shape-consistent config: dim=128, multiple_of=128
    #   hidden = int(8/3 * 128) = 341 -> rounded up to 384
    batch, seq, dim, multiple_of = 2, 8, 128, 128
    hidden = _round_hidden(dim, multiple_of)  # 384

    key = jax.random.PRNGKey(0)
    kx, k1, k2, k3 = jax.random.split(key, 4)

    x = jax.random.normal(kx, (batch, seq, dim), dtype=jnp.float32)
    # Deterministic params (equivalent to nn.Linear weights, stored transposed).
    w1 = jax.random.normal(k1, (dim, hidden), dtype=jnp.float32) * (1.0 / dim ** 0.5)
    w3 = jax.random.normal(k3, (dim, hidden), dtype=jnp.float32) * (1.0 / dim ** 0.5)
    w2 = jax.random.normal(k2, (hidden, dim), dtype=jnp.float32) * (1.0 / hidden ** 0.5)

    # --- one-time init: plan tiles for this chip and pre-pack weights --------
    plan = make_ffn_plan(dim, hidden)
    w13, w2_t = pack_ffn_weights(
        w1, w3, w2, tile_h=plan["tile_h"], compute_dtype=plan["compute_dtype"]
    )

    # --- hot path -------------------------------------------------------------
    x2d = x.reshape(batch * seq, dim)
    out = feed_forward(
        x2d, w13, w2_t,
        tile_h=plan["tile_h"],
        tile_m_pref=plan["tile_m_pref"],
        vmem_limit_bytes=plan["vmem_limit_bytes"],
    ).reshape(batch, seq, dim)
    jax.block_until_ready(out)

    # Reference in plain JAX with matching bf16-in / f32-accumulate numerics.
    f32 = jnp.float32
    xb = x2d.astype(jnp.bfloat16).astype(f32)
    w1b = w1.astype(jnp.bfloat16).astype(f32)
    w3b = w3.astype(jnp.bfloat16).astype(f32)
    w2b = w2.astype(jnp.bfloat16).astype(f32)
    gate = jax.nn.silu(xb @ w1b)
    gated = (gate * (xb @ w3b)).astype(jnp.bfloat16).astype(f32)
    ref = (gated @ w2b).reshape(batch, seq, dim)

    assert jnp.allclose(out, ref, atol=2e-2, rtol=2e-2), "mismatch vs reference"

    print("KERNEL_OK")
</pallas_src>

<mosaic_0001>
module attributes {stable_mosaic.version = 11 : i64} {
  func.func @_ffn_kernel(%arg0: i32, %arg1: i32, %arg2: memref<16x128xbf16, #tpu.memory_space<vmem>>, %arg3: memref<1x128x256xbf16, #tpu.memory_space<vmem>>, %arg4: memref<1x128x128xbf16, #tpu.memory_space<vmem>>, %arg5: memref<16x128xf32, #tpu.memory_space<vmem>>, %arg6: memref<16x128xf32, #tpu.memory_space<vmem>>) attributes {dimension_semantics = [#tpu.dimension_semantics<parallel>, #tpu.dimension_semantics<arbitrary>], iteration_bounds = array<i64: 1, 3>, scalar_prefetch = 0 : i64, scratch_operands = 1 : i64, tpu.core_type = #tpu.core_type<tc>, window_params = [{transform_indices = @transform_0, window_bounds = array<i64: 16, 128>}, {transform_indices = @transform_1, window_bounds = array<i64: 1, 128, 256>}, {transform_indices = @transform_2, window_bounds = array<i64: 1, 128, 128>}, {transform_indices = @transform_3, window_bounds = array<i64: 16, 128>}]} {
    %c0_i32 = arith.constant 0 : i32
    %0 = arith.cmpi eq, %arg1, %c0_i32 : i32
    %1 = arith.extui %0 : i1 to i32
    %c0_i32_0 = arith.constant 0 : i32
    %2 = arith.cmpi ne, %1, %c0_i32_0 : i32
    scf.if %2 {
      %cst_16 = arith.constant 0.000000e+00 : f32
      %27 = vector.broadcast %cst_16 : f32 to vector<16x128xf32>
      %c0_17 = arith.constant 0 : index
      %c0_18 = arith.constant 0 : index
      %28 = vector.load %arg6[%c0_17, %c0_18] : memref<16x128xf32, #tpu.memory_space<vmem>>, vector<16x128xf32>
      tpu.vector_store %arg6[%c0_17, %c0_18], %27 {strides = array<i32>} : memref<16x128xf32, #tpu.memory_space<vmem>>, vector<16x128xf32>,
    } else {
    }
    %c0 = arith.constant 0 : index
    %c0_1 = arith.constant 0 : index
    %3 = vector.load %arg2[%c0, %c0_1] : memref<16x128xbf16, #tpu.memory_space<vmem>>, vector<16x128xbf16>
    %c0_2 = arith.constant 0 : index
    %c0_3 = arith.constant 0 : index
    %c0_4 = arith.constant 0 : index
    %4 = vector.load %arg3[%c0_2, %c0_3, %c0_4] : memref<1x128x256xbf16, #tpu.memory_space<vmem>>, vector<1x128x256xbf16>
    %5 = vector.shape_cast %4 : vector<1x128x256xbf16> to vector<128x256xbf16>
    %cst = arith.constant dense<0.000000e+00> : vector<16x256xf32>
    %6 = tpu.matmul %3, %5, %cst {dimension_numbers = #tpu.dot_dimension_numbers<[1], [0], [0], [1], [0, 0, 1, 1], [], []>} : vector<16x128xbf16>, vector<128x256xbf16>, vector<16x256xf32> -> vector<16x256xf32>
    %7 = vector.extract_strided_slice %6 {offsets = [0, 0], sizes = [16, 128], strides = [1, 1]} : vector<16x256xf32> to vector<16x128xf32>
    %8 = vector.extract_strided_slice %6 {offsets = [0, 128], sizes = [16, 128], strides = [1, 1]} : vector<16x256xf32> to vector<16x128xf32>
    %cst_5 = arith.constant 0.000000e+00 : f32
    %9 = vector.broadcast %cst_5 : f32 to vector<16x128xf32>
    %10 = arith.subf %9, %7 : vector<16x128xf32>
    %11 = math.exp %10 : vector<16x128xf32>
    %cst_6 = arith.constant 1.000000e+00 : f32
    %12 = vector.broadcast %cst_6 : f32 to vector<16x128xf32>
    %13 = arith.addf %12, %11 : vector<16x128xf32>
    %14 = tpu.reciprocal %13 {approx = true} : vector<16x128xf32> -> vector<16x128xf32>
    %15 = arith.mulf %7, %14 : vector<16x128xf32>
    %16 = arith.mulf %15, %8 : vector<16x128xf32>
    %c0_7 = arith.constant 0 : index
    %c0_8 = arith.constant 0 : index
    %17 = vector.load %arg6[%c0_7, %c0_8] : memref<16x128xf32, #tpu.memory_space<vmem>>, vector<16x128xf32>
    %18 = arith.truncf %16 : vector<16x128xf32> to vector<16x128xbf16>
    %c0_9 = arith.constant 0 : index
    %c0_10 = arith.constant 0 : index
    %c0_11 = arith.constant 0 : index
    %19 = vector.load %arg4[%c0_9, %c0_10, %c0_11] : memref<1x128x128xbf16, #tpu.memory_space<vmem>>, vector<1x128x128xbf16>
    %20 = vector.shape_cast %19 : vector<1x128x128xbf16> to vector<128x128xbf16>
    %cst_12 = arith.constant dense<0.000000e+00> : vector<16x128xf32>
    %21 = tpu.matmul %18, %20, %cst_12 {dimension_numbers = #tpu.dot_dimension_numbers<[1], [0], [0], [1], [0, 0, 1, 1], [], []>} : vector<16x128xbf16>, vector<128x128xbf16>, vector<16x128xf32> -> vector<16x128xf32>
    %22 = arith.addf %17, %21 : vector<16x128xf32>
    %c0_13 = arith.constant 0 : index
    %c0_14 = arith.constant 0 : index
    %23 = vector.load %arg6[%c0_13, %c0_14] : memref<16x128xf32, #tpu.memory_space<vmem>>, vector<16x128xf32>
    tpu.vector_store %arg6[%c0_13, %c0_14], %22 {strides = array<i32>} : memref<16x128xf32, #tpu.memory_space<vmem>>, vector<16x128xf32>,
    %c2_i32 = arith.constant 2 : i32
    %24 = arith.cmpi eq, %arg1, %c2_i32 : i32
    %25 = arith.extui %24 : i1 to i32
    %c0_i32_15 = arith.constant 0 : i32
    %26 = arith.cmpi ne, %25, %c0_i32_15 : i32
    scf.if %26 {
      %c0_16 = arith.constant 0 : index
      %c0_17 = arith.constant 0 : index
      %27 = vector.load %arg6[%c0_16, %c0_17] : memref<16x128xf32, #tpu.memory_space<vmem>>, vector<16x128xf32>
      %c0_18 = arith.constant 0 : index
      %c0_19 = arith.constant 0 : index
      %28 = vector.load %arg5[%c0_18, %c0_19] : memref<16x128xf32, #tpu.memory_space<vmem>>, vector<16x128xf32>
      tpu.vector_store %arg5[%c0_18, %c0_19], %27 {strides = array<i32>} : memref<16x128xf32, #tpu.memory_space<vmem>>, vector<16x128xf32>,
    } else {
    }
    return
  }
  func.func @transform_0(%arg0: i32, %arg1: i32) -> (i32, i32) {
    %c0_i32 = arith.constant 0 : i32
    %c0_i32_0 = arith.constant 0 : i32
    return %arg0, %c0_i32 : i32, i32
  }
  func.func @transform_1(%arg0: i32, %arg1: i32) -> (i32, i32, i32) {
    %c0_i32 = arith.constant 0 : i32
    %c0_i32_0 = arith.constant 0 : i32
    %c0_i32_1 = arith.constant 0 : i32
    return %arg1, %c0_i32, %c0_i32_0 : i32, i32, i32
  }
  func.func @transform_2(%arg0: i32, %arg1: i32) -> (i32, i32, i32) {
    %c0_i32 = arith.constant 0 : i32
    %c0_i32_0 = arith.constant 0 : i32
    %c0_i32_1 = arith.constant 0 : i32
    return %arg1, %c0_i32, %c0_i32_0 : i32, i32, i32
  }
  func.func @transform_3(%arg0: i32, %arg1: i32) -> (i32, i32) {
    %c0_i32 = arith.constant 0 : i32
    %c0_i32_0 = arith.constant 0 : i32
    return %arg0, %c0_i32 : i32, i32
  }
}

</mosaic_0001>

<bundles_post_ra>
// kernel: feed_forward.1
= control target key start
LH: loop header
LB: loop body
LE: loop exit
PB: predicated region body
PF: predicated region fallthrough
CT: control target
= control target key end

     0   :  { %8 = vsyncpa [#allocation4], 0  ;;  %s1258_s0 = inlined_call_operand.vmem [shape: bf16[16,128], index: 0, kind: input, shape index: {}]   ;;  %s1259_s1 = inlined_call_operand.hbm [shape: bf16[3,128,256], index: 1, kind: input, shape index: {}]   ;;  %s1260_s2 = inlined_call_operand.hbm [shape: bf16[3,128,128], index: 2, kind: input, shape index: {}]   ;;  %s1261_s3 = inlined_call_operand.hbm [shape: f32[16,128], index: 3, kind: output, shape index: {}]  }
   0x1   :  { %10 = vsyncpa [#allocation4 + $0x1], 0 }
   0x2   :  { %11 = vsyncpa [#allocation7], 0 }
   0x3   :  { %13 = vsyncpa [#allocation7 + $0x1], 0 }
   0x4   :  { %14 = vsyncpa [#allocation5], 0  ;;  %s1028_s12 = smov 0   ;;  %s1030_s13 = smov 0  }
   0x5   :  { %s1032_s14 = smov 0   ;;  %s1034_s15 = smov 0  }
   0x6   :  { %s1036_s16 = smov 0   ;;  %s1038_s17 = smov 0  }
   0x7 LB: > { %s656_s18 = sadd.s32 4294967295, %s993_s17   ;;  %s29_s19 = sadd.s32 1, %s989_s16  ;;  %s993_s17 = sphi %s1038_s17, %s20_s17   ;;  %s989_s16 = sphi %s1036_s16, %s1273_s16   ;;  %s985_s15 = sphi %s1034_s15, %s1272_s15   ;;  %s981_s14 = sphi %s1032_s14, %s1271_s14   ;;  %s977_s13 = sphi %s1030_s13, %s1270_s13   ;;  %s973_s12 = sphi %s1028_s12, %s1269_s12  }
   0x8   : > { %p30_p0 = scmp.ge.s32.totalorder %s29_s19, 3  ;;  %s65_s20 = sadd.s32 1, %s981_s14 }
   0x9   : > { %p72_p1 = scmp.ne.s32.totalorder %s981_s14, %s977_s13  ;;  %p73_p2 = scmp.eq.s32.totalorder %s993_s17, 0 }
   0xa   : > { %s1275_s19 = smov (%p30_p0, %s29_s19), 0  ;;  %p78_p4 = scmp.ne.s32.totalorder %s977_s13, %s973_s12 }
   0xb   : > { %p1064_p3 = por %p73_p2, %p72_p1  ;;  %s62_s22 = ssub.s32 %s989_s16, %s1275_s19 }
   0xc   : > { %p79_p5 = scmp.eq.s32.totalorder %s656_s18, 0  ;;  %p63_p6 = scmp.eq.s32.totalorder %s62_s22, 0 }
   0xd   : > { %p746_p8 = scmp.lt.s32.totalorder %s993_s17, 3  ;;  %s1082_s25 = sand.u32 1, %s981_s14  }
   0xe   : > { %p1073_p7 = por %p79_p5, %p78_p4  ;;  %s700_s26 = sshll.u32 %s989_s16, 11 }
   0xf   : > { %s1079_s24 = scalar_select %p63_p6, %s981_s14, %s65_s20  }
  0x10   : > { %s1264_s23 = scalar_select %p1073_p7, 1, 0 }
  0x11   : > { %s660_s27 = sshll.u32 %s1082_s25, 7  ;;  %s1089_s30 = scalar_lea.hbm %s1259_s1, %s700_s26 }
  0x12   : > { %s167_s4 = scalar_lea.vmem [#allocation3], %s660_s27  ;;  %p1093_p9 = pnand %p746_p8, %p1064_p3 }
  0x13   : > { %s174_s5 = sshll.u32 %s167_s4, 4  ;;  %s164_s7 = scalar_lea.sflag [#allocation4], %s1082_s25  ;;  %s1097_s5 = int_to_ptr.vmem [resolvable:$true] %s174_s5 }
  0x14   : > { %s849_s8 = scalar_lea.hbm %s1089_s30, 2048  ;;  %p851_p11 = pneg %p1093_p9 }
  0x15   : > { %p850_p10 = scmp.ne.s32.totalorder %s1089_s30, %s849_s8  ;;  %s854_s11 = scalar_lea.hbm %s1259_s1, 6144 }
  0x16   : > { %p855_p0 = scmp.lt.u32.totalorder %s1089_s30, %s1259_s1  ;;  %p856_p1 = scmp.lt.u32.totalorder %s854_s11, %s849_s8 }
  0x17   : > { %p852_p12 = pnand %p851_p11, %p850_p10  ;;  %p858_p3 = scmp.lt.u32.totalorder %s849_s8, %s1089_s30 }
  0x18   : > { %p857_p2 = por %p856_p1, %p855_p0 }
  0x19   : > { %p853_p13 = pneg %p852_p12 }
  0x1a   : > { %p859_p4 = por %p858_p3, %p857_p2 }
  0x1c   : > { %p860_p5 = pnand %p859_p4, %p853_p13 }
  0x1e   : > { %863 = shalt.err (!%p860_p5)
}
  0x1f   : > { %s864_s21 = scalar_lea.vmem %s1097_s5, 2048  ;;  %s995_s22 = smov [#allocation3]  }
  0x20   : > { %p865_p6 = scmp.ne.s32.totalorder %s1097_s5, %s864_s21  ;;  %s869_s26 = sshll.u32 %s995_s22, 4  ;;  %s870_s26 = int_to_ptr.vmem [resolvable:$false] %s869_s26 }
  0x21   : > { %s871_s27 = scalar_lea.vmem %s870_s26, 4096  ;;  %p872_p12 = scmp.lt.s32.totalorder %s1097_s5, %s870_s26 }
  0x22   : > { %p867_p8 = pnand %p865_p6, %p851_p11  ;;  %p873_p0 = scmp.lt.s32.totalorder %s871_s27, %s864_s21 }
  0x24   : > { %p868_p10 = pneg %p867_p8  ;;  %p874_p1 = por %p873_p0, %p872_p12 }
  0x26   : > { %p875_p2 = pnand %p874_p1, %p868_p10 }
  0x28   : > { %878 = shalt.err (!%p875_p2)
}
  0x29   : > { %s996_s28 = smov 128   ;;  %s997_s29 = smov 8  }
  0x2a   : > { %742 = dma.hbm_to_vmem [thread:$0]  (!%p1093_p9), %s1089_s30, 2048, %s1097_s5, %s164_s7, %s996_s28, %s996_s28, %s997_s29  }
  0x2b   : > { %p666_p13 = scmp.ge.s32.totalorder %s993_s17, 1  ;;  %p203_p3 = scmp.lt.s32.totalorder %s993_s17, 4 }
  0x2c   : > { %s663_s4 = sshll.u32 %s1082_s25, 6  ;;  %s701_s9 = sshll.u32 %s989_s16, 10 }
  0x2d   : > { %p1130_p4 = pnand %p666_p13, %p203_p3  ;;  %s188_s10 = scalar_lea.vmem [#allocation6], %s663_s4 }
  0x2e   : > { %s195_s11 = sshll.u32 %s188_s10, 4  ;;  %s1138_s21 = scalar_lea.hbm %s1260_s2, %s701_s9  ;;  %s1140_s11 = int_to_ptr.vmem [resolvable:$true] %s195_s11 }
  0x2f   : > { %s185_s30 = scalar_lea.sflag [#allocation7], %s1082_s25  ;;  %s879_s5 = scalar_lea.hbm %s1138_s21, 1024 }
  0x30   : > { %p880_p5 = scmp.ne.s32.totalorder %s1138_s21, %s879_s5  ;;  %s884_s26 = scalar_lea.hbm %s1260_s2, 3072 }
  0x31   : > { %p885_p10 = scmp.lt.u32.totalorder %s1138_s21, %s1260_s2  ;;  %p886_p12 = scmp.lt.u32.totalorder %s884_s26, %s879_s5 }
  0x32   : > { %p882_p6 = pnand %p880_p5, %p851_p11  ;;  %p888_p1 = scmp.lt.u32.totalorder %s879_s5, %s1138_s21 }
  0x33   : > { %p887_p0 = por %p886_p12, %p885_p10 }
  0x34   : > { %p883_p8 = pneg %p882_p6 }
  0x35   : > { %p889_p2 = por %p888_p1, %p887_p0 }
  0x37   : > { %p890_p13 = pnand %p889_p2, %p883_p8 }
  0x39   : > { %893 = shalt.err (!%p890_p13)
}
  0x3a   : > { %s894_s29 = scalar_lea.vmem %s1140_s11, 1024  ;;  %s998_s4 = smov [#allocation6]  }
  0x3b   : > { %p895_p3 = scmp.ne.s32.totalorder %s1140_s11, %s894_s29  ;;  %s899_s9 = sshll.u32 %s998_s4, 4  ;;  %s900_s9 = int_to_ptr.vmem [resolvable:$false] %s899_s9 }
  0x3c   : > { %s901_s10 = scalar_lea.vmem %s900_s9, 2048  ;;  %p902_p7 = scmp.lt.s32.totalorder %s1140_s11, %s900_s9 }
  0x3d   : > { %p897_p5 = pnand %p895_p3, %p851_p11  ;;  %p903_p10 = scmp.lt.s32.totalorder %s901_s10, %s894_s29 }
  0x3f   : > { %p898_p6 = pneg %p897_p5  ;;  %p904_p12 = por %p903_p10, %p902_p7 }
  0x41   : > { %p905_p0 = pnand %p904_p12, %p898_p6 }
  0x43   : > { %908 = shalt.err (!%p905_p0)
}
  0x44   : > { %s999_s12 = smov 64   ;;  %s1000_s20 = smov 4  }
  0x45   : > { %745 = dma.hbm_to_vmem [thread:$0]  (!%p1093_p9), %s1138_s21, 1024, %s1140_s11, %s185_s30, %s999_s12, %s999_s12, %s1000_s20  }
  0x46   : > { %207 = sbr.rel (%p1130_p4) target bundleno = 622 (0x26e), region = 32  ;;  %s209_s5 = sand.u32 (!%p1130_p4), 1, %s977_s13  }
  0x47   : > { %s667_s7 = sshll.u32 (!%p1130_p4), %s209_s5, 7  ;;  %s210_s22 = scalar_lea.sflag (!%p1130_p4), [#allocation4], %s209_s5 }
  0x48   : > { %s1171_s26 = scalar_lea.vmem (!%p1130_p4), [#allocation3], %s667_s7  ;;  %p1267_p7 = scmp.ne.s32.totalorder (!%p1130_p4), %s1264_s23, 0 }
  0x4d   : > { %960 = dma.done.wait (%p1267_p7), %s210_s22, 2048  }
  0x4e   : > { %962 = vsyncadd (%p1267_p7), %s210_s22, 4294965248  ;;  %s668_s27 = sshll.u32 %s209_s5, 6  ;;  %s219_s6 = scalar_lea.sflag [#allocation7], %s209_s5 }
  0x4f   : > { %s1177_s25 = scalar_lea.vmem [#allocation6], %s668_s27 }
  0x50   : > { %964 = dma.done.wait (%p1267_p7), %s219_s6, 1024  }
  0x51   : > { %966 = vsyncadd (%p1267_p7), %s219_s6, 4294966272  ;;  %p669_p9 = scmp.ne.s32.totalorder %s985_s15, 0 }
  0x52   : > { %v1001_v0 = vmov (!%p669_p9), 0.0  }
  0x53   : > { %261 = sbr.rel (%p669_p9) target bundleno = 90 (0x5a), region = 44  ;;  %262 = vst [vmem:[#allocation2] sm:$0xff] (!%p669_p9), %v1001_v0  ;;  %263 = vst [vmem:[#allocation2 + $0x8] sm:$0xff] (!%p669_p9), %v1001_v0 }
  0x5a PF: > { %v808_v1 = vld [vmem:[%s1171_s26 + $0x4] ss:$8 sps:$4 sm:$0xff]   ;;  %v810_v2 = vld [vmem:[%s1171_s26] ss:$8 sps:$4 sm:$0xff]   ;;  %v1002_v3 = vmov 0   ;;  %v1003_v20 = vmov 0.0  }
  0x5b   : > { %400 = vmatprep.mubr.bf16.mxu0 %v1002_v3  ;;  %368 = vmatprep.subr.bf16.mxu0 %v808_v1  ;;  %v811_v4 = vld [vmem:[%s1171_s26 + $0x14] ss:$8 sps:$4 sm:$0xff]   ;;  %v813_v5 = vld [vmem:[%s1171_s26 + $0x10] ss:$8 sps:$4 sm:$0xff]   ;;  %v814_v6 = vld [vmem:[%s1171_s26 + $0x24] ss:$8 sps:$4 sm:$0xff]  }
  0x5c   : > { %369 = vmatpush1.bf16.msra.mxu0 %v810_v2  ;;  %v816_v7 = vld [vmem:[%s1171_s26 + $0x20] ss:$8 sps:$4 sm:$0xff]   ;;  %v817_v8 = vld [vmem:[%s1171_s26 + $0x34] ss:$8 sps:$4 sm:$0xff]   ;;  %v819_v9 = vld [vmem:[%s1171_s26 + $0x30] ss:$8 sps:$4 sm:$0xff]   ;;  %711 = vmatprep.subr.bf16.mxu1 %v1003_v20 }
  0x5d   : > { %370 = vmatprep.subr.bf16.mxu0 %v811_v4  ;;  %v820_v10 = vld [vmem:[%s1171_s26 + $0x44] ss:$8 sps:$4 sm:$0xff]   ;;  %v822_v11 = vld [vmem:[%s1171_s26 + $0x40] ss:$8 sps:$4 sm:$0xff]   ;;  %v823_v12 = vld [vmem:[%s1171_s26 + $0x54] ss:$8 sps:$4 sm:$0xff]  }
  0x5e   : > { %v825_v13 = vld [vmem:[%s1171_s26 + $0x50] ss:$8 sps:$4 sm:$0xff]   ;;  %v826_v14 = vld [vmem:[%s1171_s26 + $0x64] ss:$8 sps:$4 sm:$0xff]   ;;  %v828_v15 = vld [vmem:[%s1171_s26 + $0x60] ss:$8 sps:$4 sm:$0xff]  }
  0x5f   : > { %v829_v16 = vld [vmem:[%s1171_s26 + $0x74] ss:$8 sps:$4 sm:$0xff]   ;;  %v831_v17 = vld [vmem:[%s1171_s26 + $0x70] ss:$8 sps:$4 sm:$0xff]   ;;  %v832_v18 = vld [vmem:[%s1258_s0] sm:$0xff]   ;;  %vm1004_vm0 = vmmov 0  }
  0x60   : > { %371 = vmatpush1.bf16.msra.mxu0 %v813_v5  ;;  %v833_v19 = vld [vmem:[%s1177_s25] sm:$0xff]   ;;  %v834_v21 = vld [vmem:[%s1177_s25 + $0x8] sm:$0xff]   ;;  %v835_v22 = vld [vmem:[%s1177_s25 + $0x10] sm:$0xff]   ;;  %727 = vmatprep.mubr.msk.bf16.mxu1 %vm1004_vm0, %v1003_v20  ;;  %p695_p11 = scmp.ne.s32.totalorder %s985_s15, 2 }
  0x61   : > { %372 = vmatprep.subr.bf16.mxu0 %v814_v6  ;;  %712 = vmatpush3.bf16.msra.mxu1 %v833_v19  ;;  %v836_v23 = vld [vmem:[%s1177_s25 + $0x18] sm:$0xff]   ;;  %v837_v24 = vld [vmem:[%s1177_s25 + $0x20] sm:$0xff]   ;;  %v838_v25 = vld [vmem:[%s1177_s25 + $0x28] sm:$0xff]  }
  0x62   : > { %713 = vmatprep.subr.bf16.mxu1 %v1003_v20  ;;  %v839_v26 = vld [vmem:[%s1177_s25 + $0x30] sm:$0xff]   ;;  %v840_v27 = vld [vmem:[%s1177_s25 + $0x38] sm:$0xff]  }
  0x63   : > { %v425_v47 = vld [vmem:[#allocation2] sm:$0xff]  ;;  %v426_v49 = vld [vmem:[#allocation2 + $0x8] sm:$0xff] }
  0x64   : > { %373 = vmatpush1.bf16.msra.mxu0 %v816_v7 }
  0x65   : > { %374 = vmatprep.subr.bf16.mxu0 %v817_v8  ;;  %714 = vmatpush3.bf16.msra.mxu1 %v834_v21 }
  0x66   : > { %715 = vmatprep.subr.bf16.mxu1 %v1003_v20 }
  0x68   : > { %375 = vmatpush1.bf16.msra.mxu0 %v819_v9 }
  0x69   : > { %376 = vmatprep.subr.bf16.mxu0 %v820_v10  ;;  %716 = vmatpush3.bf16.msra.mxu1 %v835_v22 }
  0x6a   : > { %717 = vmatprep.subr.bf16.mxu1 %v1003_v20 }
  0x6c   : > { %377 = vmatpush1.bf16.msra.mxu0 %v822_v11 }
  0x6d   : > { %378 = vmatprep.subr.bf16.mxu0 %v823_v12  ;;  %718 = vmatpush3.bf16.msra.mxu1 %v836_v23 }
  0x6e   : > { %719 = vmatprep.subr.bf16.mxu1 %v1003_v20 }
  0x70   : > { %379 = vmatpush1.bf16.msra.mxu0 %v825_v13 }
  0x71   : > { %380 = vmatprep.subr.bf16.mxu0 %v826_v14  ;;  %720 = vmatpush3.bf16.msra.mxu1 %v837_v24 }
  0x72   : > { %721 = vmatprep.subr.bf16.mxu1 %v1003_v20 }
  0x74   : > { %381 = vmatpush1.bf16.msra.mxu0 %v828_v15 }
  0x75   : > { %382 = vmatprep.subr.bf16.mxu0 %v829_v16  ;;  %722 = vmatpush3.bf16.msra.mxu1 %v838_v25 }
  0x76   : > { %723 = vmatprep.subr.bf16.mxu1 %v1003_v20 }
  0x78   : > { %383 = vmatpush1.bf16.msra.mxu0 %v831_v17 }
  0x79   : > { %724 = vmatpush3.bf16.msra.mxu1 %v839_v26 }
  0x7a   : > { %725 = vmatprep.subr.bf16.mxu1 %v1003_v20 }
  0x7b   : > { %401 = vmatmul.mubr.bf16.vlgmr.msra.gmra.mrb[0].mxu0 %v832_v18 }
  0x7d   : > { %726 = vmatpush3.bf16.msra.mxu1 %v840_v27 }
 0x14e   : > { %v402_v28 = vpop.f32.mrb[0].mxu0 }
 0x14f   : > { %v411_v29 = vsub.f32 0.0, %v402_v28  ;;  %v404_v30 = vpop.f32.mrb[1].mxu0 }
 0x150   : > { %v406_v31 = vpop.f32.mrb[2].mxu0 }
 0x151   : > { %v413_v32 = vmul.f32 1.442695, %v411_v29  ;;  %v412_v33 = vsub.f32 0.0, %v406_v31  ;;  %v408_v34 = vpop.f32.mrb[3].mxu0 }
 0x153   : > { %841 = vpow2.f32 %v413_v32  ;;  %v415_v35 = vmul.f32 1.442695, %v412_v33 }
 0x155   : > { %843 = vpow2.f32 %v415_v35 }
 0x15d   : > { %v842_v36 = vpop.eup %841 }
 0x15e   : > { %v417_v37 = vadd.f32 1.0, %v842_v36 }
 0x15f   : > { %v844_v38 = vpop.eup %843 }
 0x160   : > { %845 = vrcp.f32 %v417_v37  ;;  %v418_v39 = vadd.f32 1.0, %v844_v38 }
 0x162   : > { %847 = vrcp.f32 %v418_v39 }
 0x16a   : > { %v846_v40 = vpop.eup %845 }
 0x16b   : > { %v421_v41 = vmul.f32 %v846_v40, %v402_v28 }
 0x16c   : > { %v848_v42 = vpop.eup %847 }
 0x16d   : > { %v423_v43 = vmul.f32 %v421_v41, %v404_v30  ;;  %v422_v44 = vmul.f32 %v848_v42, %v406_v31 }
 0x16f   : > { %v424_v45 = vmul.f32 %v422_v44, %v408_v34 }
 0x171   : > { %v427_v46 = vpack.c.bf16 %v424_v45, %v423_v43 }
 0x173   : > { %728 = vmatmul.mubr.bf16.vlgmr.msra.gmra.mrb[0].mxu1 %v427_v46 }
 0x245   : > { %540 = sbr.rel (%p695_p11) target bundleno = 596 (0x254), region = 48 }
 0x246   : > { %v526_v48 = vpop.f32.mrb[0].mxu1 }
 0x247   : > { %v533_v50 = vadd.f32 %v526_v48, %v425_v47  ;;  %v729_v51 = vpop.f32.mrb[1].mxu1 }
 0x248   : > { %v529_v52 = vpop.f32.mrb[2].mxu1 }
 0x249   : > { %535 = vst [vmem:[#allocation2] sm:$0xff] %v533_v50  ;;  %v534_v53 = vadd.f32 %v529_v52, %v426_v49  ;;  %v730_v54 = vpop.f32.mrb[3].mxu1 }
 0x24b   : > { %536 = vst [vmem:[#allocation2 + $0x8] sm:$0xff] %v534_v53 }
 0x250   : > { %v541_v55 = vld [vmem:[#allocation2] sm:$0xff] }
 0x251   : > { %543 = vst [vmem:[#allocation8] sm:$0xff] %v541_v55 }
 0x252   : > { %v542_v56 = vld [vmem:[#allocation2 + $0x8] sm:$0xff] }
 0x253   : > { %544 = vst [vmem:[#allocation8 + $0x8] sm:$0xff] %v542_v56 }
 0x254 PF: > { %p1214_p4 = scmp.eq.s32.totalorder %s656_s18, 2  ;;  %s1005_s21 = smov [#allocation8]  }
 0x255   : > { %s554_s30 = sshll.u32 %s1005_s21, 4  ;;  %s555_s30 = int_to_ptr.vmem [resolvable:$true] %s554_s30 }
 0x256   : > { %s909_s28 = scalar_lea.vmem %s555_s30, 256  ;;  %p916_p13 = scmp.lt.s32.totalorder %s555_s30, %s555_s30 }
 0x257   : > { %p910_p8 = scmp.ne.s32.totalorder %s555_s30, %s909_s28  ;;  %p917_p3 = scmp.lt.s32.totalorder %s909_s28, %s909_s28 }
 0x259   : > { %p911_p1 = pnand %p910_p8, %p1214_p4  ;;  %p918_p5 = por %p917_p3, %p916_p13 }
 0x25b   : > { %p912_p2 = pneg %p911_p1 }
 0x25d   : > { %p919_p6 = pnand %p918_p5, %p912_p2 }
 0x25f   : > { %922 = shalt.err (!%p919_p6)
}
 0x260   : > { %s923_s18 = scalar_lea.hbm %s1261_s3, 256 }
 0x261   : > { %p924_p10 = scmp.ne.s32.totalorder %s1261_s3, %s923_s18  ;;  %p929_p7 = scmp.lt.u32.totalorder %s923_s18, %s1261_s3 }
 0x263   : > { %p925_p12 = pnand %p924_p10, %p1214_p4 }
 0x265   : > { %p926_p0 = pneg %p925_p12 }
 0x267   : > { %p931_p9 = pnand %p929_p7, %p926_p0 }
 0x269   : > { %934 = shalt.err (!%p931_p9)
}
 0x26a   : > { %s1006_s20 = smov 128   ;;  %s1007_s5 = smov 8  }
 0x26b   : > { %736 = dma.vmem_to_hbm [thread:$0]  (%p1214_p4), %s555_s30, 256, %s1261_s3, [#allocation5], %s1006_s20, %s1006_s20, %s1007_s5  }
 0x26c   : > { %968 = dma.done.wait (%p1214_p4), [#allocation5], 256  }
 0x26d   : > { %970 = vsyncadd (%p1214_p4), [#allocation5], 4294967040 }
 0x26e PF: > { %s20_s17 = sadd.s32 1, %s993_s17   ;;  %s1269_s12 = smov %s977_s13 }
 0x26f   : > { %p17_p11 = scmp.ge.s32.totalorder %s20_s17, 5   ;;  %s1270_s13 = smov %s981_s14 }
 0x270   : > { %s1271_s14 = smov %s1079_s24  ;;  %s1272_s15 = smov %s989_s16 }
 0x271   : > { %s1273_s16 = smov %s1275_s19  ;;  %19 = sbr.rel (!%p17_p11) target bundleno = 7 (0x7), region = 94 }
 0x278   :  { %570 = vsyncpa [#allocation4], 1 }
 0x279   :  { %572 = vsyncpa [#allocation4 + $0x1], 1 }
 0x27a   :  { %573 = vsyncpa [#allocation7], 1 }
 0x27b   :  { %575 = vsyncpa [#allocation7 + $0x1], 1 }
 0x27c   :  { %576 = vsyncpa [#allocation5], 1 }
 0x27d   :  { %578 = vsyncpa [#allocation5 + $0x1], 1 }

</bundles_post_ra>
